<compile_context>
chip_gen: v5e
topology: v5e:2x2
jax: 0.10.0
libtpu: 0.0.40
codegen_flags: <defaults>
</compile_context>

<pallas_src>
import functools

import jax
import jax.numpy as jnp
from jax.experimental import pallas as pl
from jax.experimental.pallas import tpu as pltpu


def _round_up(n, m):
    return -(-n // m) * m


# ---------------------------------------------------------------------------
# Hardware sizing helpers (best effort; safe fallbacks)
# ---------------------------------------------------------------------------
def _pick_vmem_limit():
    """Scoped-VMEM limit: ~3/4 of physical VMEM, capped; v7x-safe fallback."""
    phys = None
    try:
        info = pltpu.get_tpu_info()
        phys = getattr(info, "vmem_capacity_bytes", None)
    except Exception:
        phys = None
    if not phys or phys <= 0:
        phys = 64 * 1024 * 1024  # conservative: v7x has 64 MiB / TC
    return min(int(phys) * 3 // 4, 112 * 1024 * 1024)


def _num_tensorcores():
    """Best-effort TensorCores-per-device (v7x has 2); fallback 1."""
    try:
        info = pltpu.get_tpu_info()
        for name in ("num_cores", "core_count", "num_tensorcores",
                     "num_tensor_cores", "tensorcore_count"):
            v = getattr(info, name, None)
            if isinstance(v, int) and v > 0:
                return v
    except Exception:
        pass
    try:
        kind = jax.devices()[0].device_kind.lower()
        if "v7" in kind:
            return 2
    except Exception:
        pass
    return 1


# ---------------------------------------------------------------------------
# Kernels
# ---------------------------------------------------------------------------
def _ca_fused_kernel(x_ref, w_ref, b_ref, o_ref, *, inv_hw):
    """Single pass: pool + 1x1 conv + bias + sigmoid + scale for one batch elem.

    x_ref: (1, C, P) native dtype   w_ref: (C, C) f32   b_ref: (C, 1) f32
    o_ref: (1, C, P) native dtype
    """
    x = x_ref[0]                                                   # (C, P)
    pooled = jnp.sum(x.astype(jnp.float32), axis=-1,
                     keepdims=True) * inv_hw                       # (C, 1) f32
    z = jnp.dot(w_ref[...], pooled,
                preferred_element_type=jnp.float32) + b_ref[...]   # (C, 1) f32
    gate = jax.nn.sigmoid(z).astype(x.dtype)                       # (C, 1)
    o_ref[0] = (x * gate).astype(o_ref.dtype)


def _ca_pool_kernel(x_ref, sum_ref, acc_ref, *, total_pixels, tile_pixels):
    """Pass 1: accumulate per-channel pixel sums over pixel tiles (masked tail).

    x_ref:   (1, C, Pt) native dtype
    sum_ref: (1, C, 1)  f32 output (written on last pixel tile)
    acc_ref: (C, 1)     f32 scratch accumulator
    """
    t = pl.program_id(1)

    @pl.when(t == 0)
    def _():
        acc_ref[...] = jnp.zeros_like(acc_ref)

    x = x_ref[0].astype(jnp.float32)                               # (C, Pt)
    # Mask lanes beyond the true pixel count (last tile reads garbage there).
    lane = jax.lax.broadcasted_iota(jnp.int32, x.shape, 1)
    x = jnp.where(t * tile_pixels + lane < total_pixels, x, 0.0)
    acc_ref[...] += jnp.sum(x, axis=-1, keepdims=True)

    @pl.when(t == pl.num_programs(1) - 1)
    def _():
        sum_ref[0] = acc_ref[...]


def _ca_scale_kernel(x_ref, gate_ref, o_ref):
    """Pass 2: o = x * gate (gate broadcast over the pixel/lane axis)."""
    o_ref[...] = (x_ref[...] * gate_ref[...]).astype(o_ref.dtype)


# ---------------------------------------------------------------------------
# Wrapper
# ---------------------------------------------------------------------------
def channel_attention_forward(x, w, b, *, max_fused_bytes=None,
                              pixel_tile=None, donate_x=False):
    """ChannelAttention forward.

    x: (B, C, H, W) (any float dtype; output keeps this dtype).
    w: (C, C) conv weight (Conv2d(C, C, 1) with the 1x1 squeezed).
    b: (C,) conv bias.
    max_fused_bytes: per-batch (C*P*itemsize) slab cap for the fused path;
                     None = auto from the VMEM limit.
    pixel_tile: force the tiled two-pass path with this lane tile.
    donate_x: alias x into the output (only use if the caller donates x).
    """
    B, C, H, W = x.shape
    P = H * W
    dtype = x.dtype
    itemsize = jnp.dtype(dtype).itemsize
    xr = x.reshape(B, C, P)                           # pure reshape, no copy
    w2 = jnp.asarray(w, jnp.float32).reshape(C, C)
    b2 = jnp.asarray(b, jnp.float32).reshape(C, 1)
    inv_hw = 1.0 / float(P)

    vmem_limit = _pick_vmem_limit()
    n_cores = _num_tensorcores()
    io_alias = {0: 0} if donate_x else {}

    slab_bytes = C * P * itemsize
    fused_budget = (vmem_limit // 6) if max_fused_bytes is None \
        else int(max_fused_bytes)
    # Fused path = 1 read + 1 write of x.  Skip it when B < num_cores (v7x
    # would idle a TensorCore) unless the spatial extent is too small to split.
    prefer_fused = (slab_bytes <= fused_budget and
                    (B >= n_cores or P <= 4 * 128))

    if pixel_tile is None and prefer_fused:
        # ---- fused single pass ----
        out = pl.pallas_call(
            functools.partial(_ca_fused_kernel, inv_hw=inv_hw),
            out_shape=jax.ShapeDtypeStruct((B, C, P), dtype),
            grid_spec=pltpu.PrefetchScalarGridSpec(
                num_scalar_prefetch=0,
                grid=(B,),
                in_specs=[
                    pl.BlockSpec((1, C, P), lambda bb: (bb, 0, 0)),
                    pl.BlockSpec((C, C), lambda bb: (0, 0)),
                    pl.BlockSpec((C, 1), lambda bb: (0, 0)),
                ],
                out_specs=pl.BlockSpec((1, C, P), lambda bb: (bb, 0, 0)),
            ),
            input_output_aliases=io_alias,
            compiler_params=pltpu.CompilerParams(
                dimension_semantics=("parallel",),
                vmem_limit_bytes=vmem_limit),
        )(xr, w2, b2)
        return out.reshape(B, C, H, W)

    # ---- tiled two pass ----
    if pixel_tile is not None:
        Pt = _round_up(int(pixel_tile), 128)
    else:
        # Size tiles purely by bytes (no artificial lane cap).
        target_block_bytes = min(8 * 1024 * 1024, vmem_limit // 6)
        Pt = (target_block_bytes // (C * itemsize)) // 128 * 128
        Pt = max(128, Pt)
    Pt = min(Pt, _round_up(P, 128))
    T = pl.cdiv(P, Pt)

    # Pass 1: per-channel pixel sums (weight/bias stay out of VMEM here).
    sums = pl.pallas_call(
        functools.partial(_ca_pool_kernel, total_pixels=P, tile_pixels=Pt),
        out_shape=jax.ShapeDtypeStruct((B, C, 1), jnp.float32),
        grid_spec=pltpu.PrefetchScalarGridSpec(
            num_scalar_prefetch=0,
            grid=(B, T),
            in_specs=[pl.BlockSpec((1, C, Pt), lambda bb, tt: (bb, 0, tt))],
            out_specs=pl.BlockSpec((1, C, 1), lambda bb, tt: (bb, 0, 0)),
            scratch_shapes=[pltpu.VMEM((C, 1), jnp.float32)],
        ),
        compiler_params=pltpu.CompilerParams(
            dimension_semantics=("parallel", "arbitrary"),
            vmem_limit_bytes=vmem_limit),
    )(xr)

    # Tiny (B,C) x (C,C) gate math in plain JAX at full precision.
    pooled = sums[:, :, 0] * inv_hw                                # (B, C) f32
    z = jnp.dot(pooled, w2.T, precision=jax.lax.Precision.HIGHEST) + b2[:, 0]
    gates = jax.nn.sigmoid(z).astype(dtype).reshape(B, C, 1)

    # Pass 2: stream x * gate (both grid axes parallel -> shards across TCs).
    out = pl.pallas_call(
        _ca_scale_kernel,
        out_shape=jax.ShapeDtypeStruct((B, C, P), dtype),
        grid_spec=pltpu.PrefetchScalarGridSpec(
            num_scalar_prefetch=0,
            grid=(B, T),
            in_specs=[
                pl.BlockSpec((1, C, Pt), lambda bb, tt: (bb, 0, tt)),
                pl.BlockSpec((1, C, 1), lambda bb, tt: (bb, 0, 0)),
            ],
            out_specs=pl.BlockSpec((1, C, Pt), lambda bb, tt: (bb, 0, tt)),
        ),
        input_output_aliases=io_alias,
        compiler_params=pltpu.CompilerParams(
            dimension_semantics=("parallel", "parallel"),
            vmem_limit_bytes=vmem_limit),
    )(xr, gates)
    return out.reshape(B, C, H, W)


# ---------------------------------------------------------------------------
# Plain-JAX reference (for correctness check)
# ---------------------------------------------------------------------------
def _channel_attention_ref(x, w, b):
    pooled = jnp.mean(x.astype(jnp.float32), axis=(2, 3))         # (B, C)
    z = jnp.einsum("bc,oc->bo", pooled, w.astype(jnp.float32),
                   precision=jax.lax.Precision.HIGHEST) + b       # (B, C)
    gate = jax.nn.sigmoid(z)
    return (x * gate[:, :, None, None].astype(x.dtype)).astype(x.dtype)


if __name__ == "__main__":
    key = jax.random.PRNGKey(0)
    k1, k2, k3, k4, k5, k6 = jax.random.split(key, 6)

    # Case 1: small shapes (batch=2, channels=4, 16x16) -> fused single pass.
    B, C, H, W = 2, 4, 16, 16
    x = jax.random.normal(k1, (B, C, H, W), dtype=jnp.float32)
    # nn.Conv2d(C, C, 1, 1, 0, bias=True): weight (C,C,1,1) -> (C,C), bias (C,)
    w = 0.2 * jax.random.normal(k2, (C, C), dtype=jnp.float32)
    b = 0.1 * jax.random.normal(k3, (C,), dtype=jnp.float32)

    y = channel_attention_forward(x, w, b)
    y = jax.block_until_ready(y)
    assert y.shape == x.shape and y.dtype == x.dtype, (y.shape, y.dtype)
    y_ref = _channel_attention_ref(x, w, b)
    assert jnp.allclose(y, y_ref, atol=1e-3, rtol=1e-3), \
        float(jnp.max(jnp.abs(y - y_ref)))

    # Case 2: force the tiled two-pass path with a non-128-aligned H*W
    # (exercises the masked remainder tile, no HBM-side pad/slice).
    B2, C2, H2, W2 = 2, 8, 60, 60
    x2 = jax.random.normal(k4, (B2, C2, H2, W2), dtype=jnp.float32)
    w2 = 0.2 * jax.random.normal(k5, (C2, C2), dtype=jnp.float32)
    b2 = 0.1 * jax.random.normal(k6, (C2,), dtype=jnp.float32)
    y2 = channel_attention_forward(x2, w2, b2, max_fused_bytes=0,
                                   pixel_tile=1024)
    y2 = jax.block_until_ready(y2)
    assert y2.shape == x2.shape and y2.dtype == x2.dtype, (y2.shape, y2.dtype)
    y2_ref = _channel_attention_ref(x2, w2, b2)
    assert jnp.allclose(y2, y2_ref, atol=1e-3, rtol=1e-3), \
        float(jnp.max(jnp.abs(y2 - y2_ref)))

    print("KERNEL_OK")
</pallas_src>

<mosaic_0001>
module attributes {stable_mosaic.version = 11 : i64} {
  func.func @_ca_fused_kernel(%arg0: i32, %arg1: memref<1x4x256xf32, #tpu.memory_space<vmem>>, %arg2: memref<4x4xf32, #tpu.memory_space<vmem>>, %arg3: memref<4x1xf32, #tpu.memory_space<vmem>>, %arg4: memref<1x4x256xf32, #tpu.memory_space<vmem>>) attributes {dimension_semantics = [#tpu.dimension_semantics<parallel>], iteration_bounds = array<i64: 2>, scalar_prefetch = 0 : i64, scratch_operands = 0 : i64, tpu.core_type = #tpu.core_type<tc>, window_params = [{transform_indices = @transform_0, window_bounds = array<i64: 1, 4, 256>}, {pipeline_mode = #tpu.pipeline_mode<synchronous>, transform_indices = @transform_1, window_bounds = array<i64: 4, 4>}, {pipeline_mode = #tpu.pipeline_mode<synchronous>, transform_indices = @transform_2, window_bounds = array<i64: 4, 1>}, {transform_indices = @transform_3, window_bounds = array<i64: 1, 4, 256>}]} {
    %c0 = arith.constant 0 : index
    %c0_0 = arith.constant 0 : index
    %c0_1 = arith.constant 0 : index
    %0 = vector.load %arg1[%c0, %c0_0, %c0_1] : memref<1x4x256xf32, #tpu.memory_space<vmem>>, vector<1x4x256xf32>
    %1 = vector.shape_cast %0 : vector<1x4x256xf32> to vector<4x256xf32>
    %cst = arith.constant dense<0.000000e+00> : vector<4xf32>
    %2 = vector.multi_reduction <add>, %1, %cst [1] : vector<4x256xf32> to vector<4xf32>
    %3 = vector.shape_cast %2 : vector<4xf32> to vector<4x1xf32>
    %cst_2 = arith.constant 3.906250e-03 : f32
    %4 = vector.broadcast %cst_2 : f32 to vector<4x1xf32>
    %5 = arith.mulf %3, %4 : vector<4x1xf32>
    %c0_3 = arith.constant 0 : index
    %c0_4 = arith.constant 0 : index
    %6 = vector.load %arg2[%c0_3, %c0_4] : memref<4x4xf32, #tpu.memory_space<vmem>>, vector<4x4xf32>
    %cst_5 = arith.constant dense<0.000000e+00> : vector<4x1xf32>
    %7 = tpu.matmul %6, %5, %cst_5 {dimension_numbers = #tpu.dot_dimension_numbers<[1], [0], [0], [1], [0, 0, 1, 1], [], []>} : vector<4x4xf32>, vector<4x1xf32>, vector<4x1xf32> -> vector<4x1xf32>
    %c0_6 = arith.constant 0 : index
    %c0_7 = arith.constant 0 : index
    %8 = vector.load %arg3[%c0_6, %c0_7] : memref<4x1xf32, #tpu.memory_space<vmem>>, vector<4x1xf32>
    %9 = arith.addf %7, %8 : vector<4x1xf32>
    %10 = arith.negf %9 : vector<4x1xf32>
    %11 = math.exp %10 : vector<4x1xf32>
    %cst_8 = arith.constant 1.000000e+00 : f32
    %12 = vector.broadcast %cst_8 : f32 to vector<4x1xf32>
    %13 = arith.addf %12, %11 : vector<4x1xf32>
    %14 = arith.divf %12, %13 : vector<4x1xf32>
    %15 = vector.broadcast %14 : vector<4x1xf32> to vector<4x256xf32>
    %16 = arith.mulf %1, %15 : vector<4x256xf32>
    %c0_9 = arith.constant 0 : index
    %c0_10 = arith.constant 0 : index
    %c0_11 = arith.constant 0 : index
    %17 = vector.load %arg4[%c0_9, %c0_10, %c0_11] : memref<1x4x256xf32, #tpu.memory_space<vmem>>, vector<1x4x256xf32>
    %18 = vector.shape_cast %17 : vector<1x4x256xf32> to vector<4x256xf32>
    %19 = vector.shape_cast %16 : vector<4x256xf32> to vector<1x4x256xf32>
    tpu.vector_store %arg4[%c0_9, %c0_10, %c0_11], %19 {strides = array<i32>} : memref<1x4x256xf32, #tpu.memory_space<vmem>>, vector<1x4x256xf32>,
    return
  }
  func.func @transform_0(%arg0: i32) -> (i32, i32, i32) {
    %c0_i32 = arith.constant 0 : i32
    %c0_i32_0 = arith.constant 0 : i32
    %c0_i32_1 = arith.constant 0 : i32
    return %arg0, %c0_i32, %c0_i32_0 : i32, i32, i32
  }
  func.func @transform_1(%arg0: i32) -> (i32, i32) {
    %c0_i32 = arith.constant 0 : i32
    %c0_i32_0 = arith.constant 0 : i32
    %c0_i32_1 = arith.constant 0 : i32
    return %c0_i32, %c0_i32_0 : i32, i32
  }
  func.func @transform_2(%arg0: i32) -> (i32, i32) {
    %c0_i32 = arith.constant 0 : i32
    %c0_i32_0 = arith.constant 0 : i32
    %c0_i32_1 = arith.constant 0 : i32
    return %c0_i32, %c0_i32_0 : i32, i32
  }
  func.func @transform_3(%arg0: i32) -> (i32, i32, i32) {
    %c0_i32 = arith.constant 0 : i32
    %c0_i32_0 = arith.constant 0 : i32
    %c0_i32_1 = arith.constant 0 : i32
    return %arg0, %c0_i32, %c0_i32_0 : i32, i32, i32
  }
}

</mosaic_0001>

<bundles_post_ra>
// kernel: tpu_custom_call.1
= control target key start
LH: loop header
LB: loop body
LE: loop exit
PB: predicated region body
PF: predicated region fallthrough
CT: control target
= control target key end

     0   :  { %8 = vsyncpa [#allocation3], 0  ;;  %s678_s0 = inlined_call_operand.hbm [shape: f32[2,4,256], index: 0, kind: input, shape index: {}]   ;;  %s679_s1 = inlined_call_operand.vmem [shape: f32[4,4], index: 1, kind: input, shape index: {}]   ;;  %s680_s2 = inlined_call_operand.vmem [shape: f32[4,1], index: 2, kind: input, shape index: {}]   ;;  %s681_s3 = inlined_call_operand.hbm [shape: f32[2,4,256], index: 3, kind: output, shape index: {}]  }
   0x1   :  { %10 = vsyncpa [#allocation3 + $0x1], 0 }
   0x2   :  { %11 = vsyncpa [#allocation4], 0 }
   0x3   :  { %13 = vsyncpa [#allocation4 + $0x1], 0  ;;  %s541_s12 = smov 0   ;;  %s543_s13 = smov 0  }
   0x4   :  { %s545_s14 = smov 0   ;;  %s547_s15 = smov 0  }
   0x5 LB: > { %s562_s16 = sadd.s32 4294967295, %s517_s15   ;;  %s349_s17 = sadd.s32 4294967294, %s517_s15   ;;  %s517_s15 = sphi %s547_s15, %s691_s15   ;;  %s513_s14 = sphi %s545_s14, %s690_s14   ;;  %s509_s13 = sphi %s543_s13, %s689_s13   ;;  %s505_s12 = sphi %s541_s12, %s688_s12  }
   0x6   : > { %s566_s18 = sadd.s32 1, %s517_s15   ;;  %s26_s19 = sadd.s32 1, %s513_s14 }
   0x7   : > { %s23_s20 = ssub.s32 %s517_s15, %s566_s18  ;;  %p33_p0 = scmp.ne.s32.totalorder %s513_s14, %s509_s13 }
   0x8   : > { %p24_p1 = scmp.eq.s32.totalorder %s23_s20, 0  ;;  %p34_p2 = scmp.eq.s32.totalorder %s517_s15, 0 }
   0x9   : > { %p39_p3 = scmp.ne.s32.totalorder %s509_s13, %s505_s12  ;;  %p40_p4 = scmp.eq.s32.totalorder %s562_s16, 0 }
   0xa   : > { %s578_s21 = scalar_select %p24_p1, %s513_s14, %s26_s19  }
   0xb   : > { %p580_p5 = por %p34_p2, %p33_p0  ;;  %p584_p6 = por %p40_p4, %p39_p3 }
   0xc   : > { %p105_p7 = scmp.eq.s32.totalorder %s562_s16, 1  ;;  %p111_p8 = scmp.eq.s32.totalorder %s349_s17, 1 }
   0xd   : > { %p380_p10 = scmp.lt.s32.totalorder %s517_s15, 2  ;;  %s137_s26 = sand.u32 1, %s513_s14  }
   0xe   : > { %p591_p11 = por %p105_p7, %p33_p0  ;;  %p595_p12 = por %p111_p8, %p39_p3 }
   0xf   : > { %s366_s27 = sshll.u32 %s517_s15, 3  ;;  %s352_s28 = sshll.u32 %s137_s26, 3 }
  0x10   : > { %s146_s4 = scalar_lea.hbm %s678_s0, %s366_s27  ;;  %s141_s6 = scalar_lea.vmem [#allocation2], %s352_s28 }
  0x11   : > { %s148_s5 = sshll.u32 %s146_s4, 4  ;;  %s150_s7 = sshll.u32 %s141_s6, 4  ;;  %s149_s5 = int_to_ptr.hbm [resolvable:$true] %s148_s5  ;;  %s151_s7 = int_to_ptr.vmem [resolvable:$true] %s150_s7 }
  0x12   : > { %p606_p13 = pnand %p380_p10, %p580_p5  ;;  %p355_p0 = scmp.ge.s32.totalorder %s517_s15, 1 }
  0x13   : > { %p155_p1 = scmp.lt.s32.totalorder %s517_s15, 3  ;;  %s138_s9 = scalar_lea.sflag [#allocation3], %s137_s26 }
  0x14   : > { %s421_s10 = sshra.s32 %s149_s5, 4  ;;  %p425_p3 = pneg %p606_p13  ;;  %s422_s10 = int_to_ptr.hbm [resolvable:$true] %s421_s10 }
  0x15   : > { %s423_s11 = scalar_lea.hbm %s422_s10, 8  ;;  %s428_s20 = scalar_lea.hbm %s678_s0, 16 }
  0x16   : > { %p424_p2 = scmp.ne.s32.totalorder %s422_s10, %s423_s11  ;;  %p429_p5 = scmp.lt.s32.totalorder %s422_s10, %s678_s0 }
  0x17   : > { %p430_p8 = scmp.lt.s32.totalorder %s428_s20, %s423_s11 }
  0x18   : > { %p426_p4 = pnand %p425_p3, %p424_p2 }
  0x19   : > { %p431_p10 = por %p430_p8, %p429_p5 }
  0x1a   : > { %p427_p7 = pneg %p426_p4 }
  0x1c   : > { %p432_p9 = pnand %p431_p10, %p427_p7 }
  0x1e   : > { %435 = shalt.err (!%p432_p9)
}
  0x1f   : > { %375 = dma.hbm_to_vmem [thread:$0]  (!%p606_p13), %s149_s5, 128, %s151_s7, %s138_s9  }
  0x20   : > { %p156_p2 = pnand %p355_p0, %p155_p1 }
  0x21   : > { %s627_s26 = sand.u32 (!%p156_p2), 1, %s509_s13  }
  0x22   : > { %159 = sbr.rel (%p156_p2) target bundleno = 449 (0x1c1), region = 32  ;;  %s356_s28 = sshll.u32 (!%p156_p2), %s627_s26, 3 }
  0x23   : > { %s162_s29 = scalar_lea.sflag (!%p156_p2), [#allocation3], %s627_s26  ;;  %s165_s30 = scalar_lea.vmem (!%p156_p2), [#allocation2], %s356_s28 }
  0x27   : > { %496 = dma.done.wait (%p584_p6), %s162_s29, 128  }
  0x28   : > { %498 = vsyncadd (%p584_p6), %s162_s29, 4294967168  ;;  %v189_v0 = vld [vmem:[%s165_s30] sm:$0xff]  ;;  %vm196_vm0 = vcmask 1043456   ;;  %v203_v8 = vld [vmem:[%s679_s1] sm:$0xf]  ;;  %vm205_vm1 = vcmask 31744  }
  0x29   : > { %191 = vst [vmem:[#allocation1] ss:$2 sm:$0xff] %v189_v0  ;;  %v519_v9 = vmov 0   ;;  %v204_v10 = vld [vmem:[%s680_s2] sm:$0xf]  ;;  %s367_s7 = sshll.u32 %s562_s16, 3 }
  0x2a   : > { %416 = vset.pattern.permute.xlu0 %v519_v9  ;;  %v520_v26 = vmov 839922192   ;;  %s274_s10 = scalar_lea.hbm %s681_s3, %s367_s7  ;;  %s188_s11 = scalar_lea.vmem [#allocation5], %s356_s28 }
  0x2b   : > { %v256_v27 = vunpack.c.l.s4 %v520_v26  ;;  %s276_s17 = sshll.u32 %s188_s11, 4  ;;  %s278_s19 = sshll.u32 %s274_s10, 4  ;;  %s277_s17 = int_to_ptr.vmem [resolvable:$true] %s276_s17  ;;  %s279_s19 = int_to_ptr.hbm [resolvable:$true] %s278_s19 }
  0x2c   : > { %s263_s20 = scalar_lea.sflag [#allocation4], %s627_s26  ;;  %s465_s22 = sshra.s32 %s279_s19, 4  ;;  %s466_s22 = int_to_ptr.hbm [resolvable:$true] %s465_s22 }
  0x2d   : > { %v257_v28 = vunpack.c.0.s8 %v256_v27  ;;  %s467_s16 = scalar_lea.hbm %s466_s22, 8  ;;  %s471_s30 = scalar_lea.hbm %s681_s3, 16 }
  0x2e   : > { %p468_p6 = scmp.ne.s32.totalorder %s466_s22, %s467_s16  ;;  %p472_p0 = scmp.lt.s32.totalorder %s466_s22, %s681_s3 }
  0x2f   : > { %p473_p1 = scmp.lt.s32.totalorder %s471_s30, %s467_s16 }
  0x30   : > { %v192_v1 = vld.sshfl [vmem:[#allocation1] sm:$0xff pattern:$0x75316420]  ;;  %v193_v2 = vld.sshfl [vmem:[#allocation1 + $0x8] sm:$0xff pattern:$0x75316420]  ;;  %p469_p9 = pnand %p468_p6, %p591_p11 }
  0x31   : > { %v197_v3 = vsel %vm196_vm0, %v192_v1, 0.0  ;;  %v198_v4 = vsel %vm196_vm0, %v193_v2, 0.0  ;;  %p474_p3 = por %p473_p1, %p472_p0 }
  0x32   : > { %v199_v5 = vadd.f32 %v198_v4, %v197_v3  ;;  %p470_p13 = pneg %p469_p9 }
  0x34   : > { %200 = vadd.xlane.f32.xlu0 %v199_v5  ;;  %p475_p4 = pnand %p474_p3, %p470_p13 }
  0xa7   : > { %v201_v6 = vpop.xlane.xlu0 %200 }
  0xa8   : > { %v202_v7 = vmul.f32 0.00390625, %v201_v6 }
  0xaa   : > { %358 = vmatpush.msk.msra.mxu0 %vm196_vm0, %v202_v7 }
  0xab   : > { %359 = vmatmul.msk.f32.vlgmr.msra.gmra.mxu0 %vm205_vm1, %v203_v8 }
 0x128   : > { %v229_v11 = vpop.f32.mrf.mxu0 }
 0x129   : > { %v230_v12 = vadd.f32 %v229_v11, %v204_v10 }
 0x12b   : > { %v360_v13 = vmul.f32 -1.442695, %v230_v12 }
 0x12d   : > { %417 = vpow2.f32 %v360_v13 }
 0x133   : > { %v418_v14 = vpop.eup %417 }
 0x134   : > { %v235_v15 = vadd.f32 1.0, %v418_v14 }
 0x136   : > { %419 = vrcp.f32 %v235_v15  ;;  %v247_v19 = vand.u32 2147483648, %v235_v15  ;;  %v245_v21 = vand.u32 2147483647, %v235_v15  ;;  %vm241_vm3 = vweird.f32 %v235_v15 }
 0x138   : > { %v248_v23 = vor.u32 1.1754944e-38, %v247_v19  ;;  %vm246_vm5 = vcmp.eq.f32.partialorder %v245_v21, 8.507059e+37 }
 0x13c   : > { %v420_v16 = vpop.eup %419 }
 0x13d   : > { %v237_v17 = vmul.f32 %v420_v16, %v235_v15  ;;  %vm242_vm2 = vweird.f32 %v420_v16 }
 0x13e   : > { %vm243_vm4 = vmor %vm241_vm3, %vm242_vm2 }
 0x13f   : > { %v238_v18 = vsub.f32 1.0, %v237_v17 }
 0x141   : > { %v239_v20 = vmul.f32 %v420_v16, %v238_v18 }
 0x143   : > { %v240_v22 = vadd.f32 %v420_v16, %v239_v20 }
 0x145   : > { %v244_v24 = vsel %vm243_vm4, %v420_v16, %v240_v22 }
 0x146   : > { %v249_v25 = vsel %vm246_vm5, %v248_v23, %v244_v24 }
 0x147   : > { %253 = vperm.xlu0 %416, %v249_v25  }
 0x1b9   : > { %v254_v29 = vpop.permute.xlu0 %253 }
 0x1ba   : > { %v258_v30 = vperm.slane %v254_v29, %v257_v28 }
 0x1bc   : > { %v260_v31 = vmul.f32 %v258_v30, %v189_v0 }
 0x1be   : > { %261 = vst [vmem:[%s188_s11] sm:$0xff] %v260_v31 }
 0x1bf   : > { %478 = shalt.err (!%p475_p4)
}
 0x1c0   : > { %370 = dma.vmem_to_hbm [thread:$0]  (%p591_p11), %s277_s17, 128, %s279_s19, %s263_s20  }
 0x1c1 PF: > { %s290_s26 = sand.u32 1, %s505_s12   ;;  %p687_p7 = scmp.ge.s32.totalorder %s517_s15, 2 }
 0x1c2   : > { %s291_s5 = scalar_lea.sflag [#allocation4], %s290_s26 }
 0x1c3   : > { %p377_p5 = pnand %p687_p7, %p595_p12 }
 0x1c5   : > { %p378_p8 = pneg %p377_p5 }
 0x1c7   : > { %500 = dma.done.wait (%p378_p8), %s291_s5, 128  }
 0x1c8   : > { %502 = vsyncadd (%p378_p8), %s291_s5, 4294967168  ;;  %p16_p10 = scmp.ge.s32.totalorder %s566_s18, 4   ;;  %s688_s12 = smov %s509_s13 }
 0x1c9   : > { %s689_s13 = smov %s513_s14  ;;  %s690_s14 = smov %s578_s21 }
 0x1ca   : > { %s691_s15 = smov %s566_s18  ;;  %18 = sbr.rel (!%p16_p10) target bundleno = 5 (0x5), region = 77 }
 0x1cf   :  { %297 = vsyncpa [#allocation3], 1 }
 0x1d0   :  { %299 = vsyncpa [#allocation3 + $0x1], 1 }
 0x1d1   :  { %300 = vsyncpa [#allocation4], 1 }
 0x1d2   :  { %302 = vsyncpa [#allocation4 + $0x1], 1 }

</bundles_post_ra>
